<compile_context>
chip_gen: v7x
topology: tpu7x:2x2x1
jax: 0.10.0
libtpu: 0.0.40
codegen_flags: <defaults>
</compile_context>

<pallas_src>
import functools

import jax
import jax.numpy as jnp
from jax.experimental import pallas as pl
from jax.experimental.pallas import tpu as pltpu


def _conv_set_kernel(x_ref, w_ref, gamma_ref, beta_ref, o_ref,
                     sum_ref, sumsq_ref, *, eps, negative_slope, k_size):
    """Per-grid-step: conv for one batch element + fused BN stats; finalize at end."""
    n = pl.program_id(0)
    N, C_out, L_out = o_ref.shape

    @pl.when(n == 0)
    def _init():
        sum_ref[...] = jnp.zeros_like(sum_ref)
        sumsq_ref[...] = jnp.zeros_like(sumsq_ref)

    # ---- Conv1d (stride=1, pad=0, dilation=1, groups=1) as ONE matmul ----
    # im2col slab: K shifted lane-windows of this batch element stacked along the
    # contraction axis; rows ordered (k, c_in) to match w_ref's column order.
    cols = [x_ref[0, :, k:k + L_out] for k in range(k_size)]   # each (C_in, L_out)
    xcol = jnp.concatenate(cols, axis=0)                       # (K*C_in, L_out)
    conv_n = jnp.dot(w_ref[...], xcol,
                     preferred_element_type=jnp.float32)       # (C_out, L_out)

    # Accumulate conv result straight into the VMEM-resident output block
    # (no separate acc scratch), plus single-pass per-channel BN statistics.
    o_ref[n] = conv_n
    sum_ref[...] += jnp.sum(conv_n, axis=1, keepdims=True)           # (C_out, 1)
    sumsq_ref[...] += jnp.sum(conv_n * conv_n, axis=1, keepdims=True)

    # ---- BatchNorm1d (training mode, biased var) + LeakyReLU, in place ----
    @pl.when(n == pl.num_programs(0) - 1)
    def _finalize():
        inv_cnt = 1.0 / float(N * L_out)
        mean = sum_ref[...] * inv_cnt                                 # (C_out, 1)
        var = sumsq_ref[...] * inv_cnt - mean * mean
        scale = gamma_ref[...] * jax.lax.rsqrt(var + eps)             # folded affine
        shift = beta_ref[...] - mean * scale
        y = o_ref[...] * scale[None, :, :] + shift[None, :, :]        # (N, C_out, L_out)
        o_ref[...] = jnp.where(y > 0, y, negative_slope * y)


def conv_set_forward(x_ncl, weight, bias, gamma, beta, *,
                     eps=1e-5, negative_slope=0.01, compute_dtype=jnp.float32):
    """x_ncl: (N, C_in, L) like PyTorch. Returns (N, C_out, L_out) in NCL layout.

    compute_dtype=jnp.bfloat16 is recommended on v6e/v7x for the matmul operands
    (accumulation and BN math stay f32); default f32 keeps bit-tight accuracy.
    """
    N, C_in, L = x_ncl.shape
    C_out, C_in_w, K = weight.shape
    assert C_in == C_in_w
    L_out = L - K + 1

    x = x_ncl.astype(compute_dtype)                                   # stays NCL
    # (C_out, C_in, K) -> (C_out, K*C_in); columns ordered (k, c_in) to match im2col.
    w_mat = jnp.transpose(weight, (0, 2, 1)).reshape(C_out, K * C_in)
    w_mat = w_mat.astype(compute_dtype)
    g2 = gamma.reshape(C_out, 1).astype(jnp.float32)
    b2 = beta.reshape(C_out, 1).astype(jnp.float32)
    # Conv bias is mathematically cancelled by the training-mode BatchNorm mean
    # subtraction, so it is not sent to the kernel at all.
    del bias

    kernel = functools.partial(_conv_set_kernel, eps=eps,
                               negative_slope=negative_slope, k_size=K)

    grid_spec = pltpu.PrefetchScalarGridSpec(
        num_scalar_prefetch=0,
        grid=(N,),
        in_specs=[
            pl.BlockSpec((1, C_in, L), lambda n: (n, 0, 0)),          # pipelined per-n
            pl.BlockSpec((C_out, K * C_in), lambda n: (0, 0)),        # resident weights
            pl.BlockSpec((C_out, 1), lambda n: (0, 0)),
            pl.BlockSpec((C_out, 1), lambda n: (0, 0)),
        ],
        # Output block index constant across the grid -> VMEM-resident accumulator,
        # written back to HBM once after the in-place BN/LeakyReLU finalize.
        out_specs=pl.BlockSpec((N, C_out, L_out), lambda n: (0, 0, 0)),
        scratch_shapes=[pltpu.VMEM((C_out, 1), jnp.float32),          # sum
                        pltpu.VMEM((C_out, 1), jnp.float32)],         # sum of squares
    )

    return pl.pallas_call(
        kernel,
        out_shape=jax.ShapeDtypeStruct((N, C_out, L_out), jnp.float32),
        grid_spec=grid_spec,
        compiler_params=pltpu.CompilerParams(
            # The N axis carries BN statistics and the resident output block, so it
            # must stay a sequential ("arbitrary") axis in this single-pass design.
            dimension_semantics=("arbitrary",)),
    )(x, w_mat, g2, b2)


def _reference(x_ncl, weight, bias, gamma, beta, eps=1e-5, negative_slope=0.01):
    """Pure-JAX reference mirroring the PyTorch module (training-mode BN)."""
    conv = jax.lax.conv_general_dilated(
        x_ncl.astype(jnp.float32), weight.astype(jnp.float32),
        window_strides=(1,), padding="VALID",
        dimension_numbers=("NCH", "OIH", "NCH"))
    conv = conv + bias[None, :, None]
    mean = jnp.mean(conv, axis=(0, 2), keepdims=True)
    var = jnp.mean((conv - mean) ** 2, axis=(0, 2), keepdims=True)
    y = (conv - mean) / jnp.sqrt(var + eps)
    y = y * gamma[None, :, None] + beta[None, :, None]
    return jnp.where(y > 0, y, negative_slope * y)


if __name__ == "__main__":
    # small shapes consistent with conv_set(in_channels=4, out_channels=8, kernel_size=3)
    N, C_in, L = 2, 4, 16
    C_out, K = 8, 3

    key = jax.random.PRNGKey(0)
    kx, kw, kb = jax.random.split(key, 3)

    x = jax.random.normal(kx, (N, C_in, L), dtype=jnp.float32)

    # deterministic parameter init (PyTorch-like uniform bound for Conv1d)
    bound = 1.0 / (C_in * K) ** 0.5
    weight = jax.random.uniform(kw, (C_out, C_in, K), minval=-bound, maxval=bound,
                                dtype=jnp.float32)
    bias = jax.random.uniform(kb, (C_out,), minval=-bound, maxval=bound,
                              dtype=jnp.float32)
    gamma = jnp.ones((C_out,), jnp.float32)   # BatchNorm affine defaults
    beta = jnp.zeros((C_out,), jnp.float32)

    out = conv_set_forward(x, weight, bias, gamma, beta)
    out = jax.block_until_ready(out)

    ref = _reference(x, weight, bias, gamma, beta)
    assert out.shape == (N, C_out, L - K + 1), out.shape
    assert jnp.allclose(out, ref, rtol=1e-4, atol=1e-4), (
        float(jnp.max(jnp.abs(out - ref))))

    print("KERNEL_OK")
</pallas_src>

<mosaic_0001>
module attributes {stable_mosaic.version = 11 : i64} {
  func.func @_conv_set_kernel(%arg0: i32, %arg1: memref<1x4x16xf32, #tpu.memory_space<vmem>>, %arg2: memref<8x12xf32, #tpu.memory_space<vmem>>, %arg3: memref<8x1xf32, #tpu.memory_space<vmem>>, %arg4: memref<8x1xf32, #tpu.memory_space<vmem>>, %arg5: memref<2x8x14xf32, #tpu.memory_space<vmem>>, %arg6: memref<8x1xf32, #tpu.memory_space<vmem>>, %arg7: memref<8x1xf32, #tpu.memory_space<vmem>>) attributes {dimension_semantics = [#tpu.dimension_semantics<arbitrary>], iteration_bounds = array<i64: 2>, scalar_prefetch = 0 : i64, scratch_operands = 2 : i64, tpu.core_type = #tpu.core_type<tc>, window_params = [{transform_indices = @transform_0, window_bounds = array<i64: 1, 4, 16>}, {pipeline_mode = #tpu.pipeline_mode<synchronous>, transform_indices = @transform_1, window_bounds = array<i64: 8, 12>}, {pipeline_mode = #tpu.pipeline_mode<synchronous>, transform_indices = @transform_2, window_bounds = array<i64: 8, 1>}, {pipeline_mode = #tpu.pipeline_mode<synchronous>, transform_indices = @transform_3, window_bounds = array<i64: 8, 1>}, {pipeline_mode = #tpu.pipeline_mode<synchronous>, transform_indices = @transform_4, window_bounds = array<i64: 2, 8, 14>}]} {
    %c0_i32 = arith.constant 0 : i32
    %0 = arith.cmpi eq, %arg0, %c0_i32 : i32
    %1 = arith.extui %0 : i1 to i32
    %c0_i32_0 = arith.constant 0 : i32
    %2 = arith.cmpi ne, %1, %c0_i32_0 : i32
    scf.if %2 {
      %cst_22 = arith.constant 0.000000e+00 : f32
      %30 = vector.broadcast %cst_22 : f32 to vector<8x1xf32>
      %c0_23 = arith.constant 0 : index
      %c0_24 = arith.constant 0 : index
      %31 = vector.load %arg6[%c0_23, %c0_24] : memref<8x1xf32, #tpu.memory_space<vmem>>, vector<8x1xf32>
      tpu.vector_store %arg6[%c0_23, %c0_24], %30 {strides = array<i32>} : memref<8x1xf32, #tpu.memory_space<vmem>>, vector<8x1xf32>,
      %cst_25 = arith.constant 0.000000e+00 : f32
      %32 = vector.broadcast %cst_25 : f32 to vector<8x1xf32>
      %c0_26 = arith.constant 0 : index
      %c0_27 = arith.constant 0 : index
      %33 = vector.load %arg7[%c0_26, %c0_27] : memref<8x1xf32, #tpu.memory_space<vmem>>, vector<8x1xf32>
      tpu.vector_store %arg7[%c0_26, %c0_27], %32 {strides = array<i32>} : memref<8x1xf32, #tpu.memory_space<vmem>>, vector<8x1xf32>,
    } else {
    }
    %c0 = arith.constant 0 : index
    %c0_1 = arith.constant 0 : index
    %c0_2 = arith.constant 0 : index
    %3 = vector.load %arg1[%c0, %c0_1, %c0_2] : memref<1x4x16xf32, #tpu.memory_space<vmem>>, vector<1x4x14xf32>
    %4 = vector.shape_cast %3 : vector<1x4x14xf32> to vector<4x14xf32>
    %c0_3 = arith.constant 0 : index
    %c0_4 = arith.constant 0 : index
    %c1 = arith.constant 1 : index
    %5 = vector.load %arg1[%c0_3, %c0_4, %c1] : memref<1x4x16xf32, #tpu.memory_space<vmem>>, vector<1x4x14xf32>
    %6 = vector.shape_cast %5 : vector<1x4x14xf32> to vector<4x14xf32>
    %c0_5 = arith.constant 0 : index
    %c0_6 = arith.constant 0 : index
    %c2 = arith.constant 2 : index
    %7 = vector.load %arg1[%c0_5, %c0_6, %c2] : memref<1x4x16xf32, #tpu.memory_space<vmem>>, vector<1x4x14xf32>
    %8 = vector.shape_cast %7 : vector<1x4x14xf32> to vector<4x14xf32>
    %9 = tpu.concatenate %4, %6, %8 in 0 : vector<4x14xf32>, vector<4x14xf32>, vector<4x14xf32> -> vector<12x14xf32>
    %c0_7 = arith.constant 0 : index
    %c0_8 = arith.constant 0 : index
    %10 = vector.load %arg2[%c0_7, %c0_8] : memref<8x12xf32, #tpu.memory_space<vmem>>, vector<8x12xf32>
    %cst = arith.constant dense<0.000000e+00> : vector<8x14xf32>
    %11 = tpu.matmul %10, %9, %cst {dimension_numbers = #tpu.dot_dimension_numbers<[1], [0], [0], [1], [0, 0, 1, 1], [], []>} : vector<8x12xf32>, vector<12x14xf32>, vector<8x14xf32> -> vector<8x14xf32>
    %12 = arith.index_cast %arg0 : i32 to index
    %c0_9 = arith.constant 0 : index
    %c0_10 = arith.constant 0 : index
    %13 = vector.load %arg5[%12, %c0_9, %c0_10] : memref<2x8x14xf32, #tpu.memory_space<vmem>>, vector<1x8x14xf32>
    %14 = vector.shape_cast %13 : vector<1x8x14xf32> to vector<8x14xf32>
    %15 = vector.shape_cast %11 : vector<8x14xf32> to vector<1x8x14xf32>
    tpu.vector_store %arg5[%12, %c0_9, %c0_10], %15 {strides = array<i32>} : memref<2x8x14xf32, #tpu.memory_space<vmem>>, vector<1x8x14xf32>,
    %c0_11 = arith.constant 0 : index
    %c0_12 = arith.constant 0 : index
    %16 = vector.load %arg6[%c0_11, %c0_12] : memref<8x1xf32, #tpu.memory_space<vmem>>, vector<8x1xf32>
    %cst_13 = arith.constant dense<0.000000e+00> : vector<8xf32>
    %17 = vector.multi_reduction <add>, %11, %cst_13 [1] : vector<8x14xf32> to vector<8xf32>
    %18 = vector.shape_cast %17 : vector<8xf32> to vector<8x1xf32>
    %19 = arith.addf %16, %18 : vector<8x1xf32>
    %c0_14 = arith.constant 0 : index
    %c0_15 = arith.constant 0 : index
    %20 = vector.load %arg6[%c0_14, %c0_15] : memref<8x1xf32, #tpu.memory_space<vmem>>, vector<8x1xf32>
    tpu.vector_store %arg6[%c0_14, %c0_15], %19 {strides = array<i32>} : memref<8x1xf32, #tpu.memory_space<vmem>>, vector<8x1xf32>,
    %c0_16 = arith.constant 0 : index
    %c0_17 = arith.constant 0 : index
    %21 = vector.load %arg7[%c0_16, %c0_17] : memref<8x1xf32, #tpu.memory_space<vmem>>, vector<8x1xf32>
    %22 = arith.mulf %11, %11 : vector<8x14xf32>
    %cst_18 = arith.constant dense<0.000000e+00> : vector<8xf32>
    %23 = vector.multi_reduction <add>, %22, %cst_18 [1] : vector<8x14xf32> to vector<8xf32>
    %24 = vector.shape_cast %23 : vector<8xf32> to vector<8x1xf32>
    %25 = arith.addf %21, %24 : vector<8x1xf32>
    %c0_19 = arith.constant 0 : index
    %c0_20 = arith.constant 0 : index
    %26 = vector.load %arg7[%c0_19, %c0_20] : memref<8x1xf32, #tpu.memory_space<vmem>>, vector<8x1xf32>
    tpu.vector_store %arg7[%c0_19, %c0_20], %25 {strides = array<i32>} : memref<8x1xf32, #tpu.memory_space<vmem>>, vector<8x1xf32>,
    %c1_i32 = arith.constant 1 : i32
    %27 = arith.cmpi eq, %arg0, %c1_i32 : i32
    %28 = arith.extui %27 : i1 to i32
    %c0_i32_21 = arith.constant 0 : i32
    %29 = arith.cmpi ne, %28, %c0_i32_21 : i32
    scf.if %29 {
      %c0_22 = arith.constant 0 : index
      %c0_23 = arith.constant 0 : index
      %30 = vector.load %arg6[%c0_22, %c0_23] : memref<8x1xf32, #tpu.memory_space<vmem>>, vector<8x1xf32>
      %cst_24 = arith.constant 0.0357142873 : f32
      %31 = vector.broadcast %cst_24 : f32 to vector<8x1xf32>
      %32 = arith.mulf %30, %31 : vector<8x1xf32>
      %c0_25 = arith.constant 0 : index
      %c0_26 = arith.constant 0 : index
      %33 = vector.load %arg7[%c0_25, %c0_26] : memref<8x1xf32, #tpu.memory_space<vmem>>, vector<8x1xf32>
      %cst_27 = arith.constant 0.0357142873 : f32
      %34 = vector.broadcast %cst_27 : f32 to vector<8x1xf32>
      %35 = arith.mulf %33, %34 : vector<8x1xf32>
      %36 = arith.mulf %32, %32 : vector<8x1xf32>
      %37 = arith.subf %35, %36 : vector<8x1xf32>
      %c0_28 = arith.constant 0 : index
      %c0_29 = arith.constant 0 : index
      %38 = vector.load %arg3[%c0_28, %c0_29] : memref<8x1xf32, #tpu.memory_space<vmem>>, vector<8x1xf32>
      %cst_30 = arith.constant 9.99999974E-6 : f32
      %39 = vector.broadcast %cst_30 : f32 to vector<8x1xf32>
      %40 = arith.addf %37, %39 : vector<8x1xf32>
      %41 = math.rsqrt %40 : vector<8x1xf32>
      %42 = arith.mulf %38, %41 : vector<8x1xf32>
      %c0_31 = arith.constant 0 : index
      %c0_32 = arith.constant 0 : index
      %43 = vector.load %arg4[%c0_31, %c0_32] : memref<8x1xf32, #tpu.memory_space<vmem>>, vector<8x1xf32>
      %44 = arith.mulf %32, %42 : vector<8x1xf32>
      %45 = arith.subf %43, %44 : vector<8x1xf32>
      %c0_33 = arith.constant 0 : index
      %c0_34 = arith.constant 0 : index
      %c0_35 = arith.constant 0 : index
      %46 = vector.load %arg5[%c0_33, %c0_34, %c0_35] : memref<2x8x14xf32, #tpu.memory_space<vmem>>, vector<2x8x14xf32>
      %47 = vector.shape_cast %42 : vector<8x1xf32> to vector<1x8x1xf32>
      %48 = vector.broadcast %47 : vector<1x8x1xf32> to vector<2x8x14xf32>
      %49 = arith.mulf %46, %48 : vector<2x8x14xf32>
      %50 = vector.shape_cast %45 : vector<8x1xf32> to vector<1x8x1xf32>
      %51 = vector.broadcast %50 : vector<1x8x1xf32> to vector<2x8x14xf32>
      %52 = arith.addf %49, %51 : vector<2x8x14xf32>
      %cst_36 = arith.constant 0.000000e+00 : f32
      %53 = vector.broadcast %cst_36 : f32 to vector<2x8x14xf32>
      %54 = arith.cmpf ogt, %52, %53 : vector<2x8x14xf32>
      %cst_37 = arith.constant 0.00999999977 : f32
      %55 = vector.broadcast %cst_37 : f32 to vector<2x8x14xf32>
      %56 = arith.mulf %55, %52 : vector<2x8x14xf32>
      %57 = arith.select %54, %52, %56 : vector<2x8x14xi1>, vector<2x8x14xf32>
      %c0_38 = arith.constant 0 : index
      %c0_39 = arith.constant 0 : index
      %c0_40 = arith.constant 0 : index
      %58 = vector.load %arg5[%c0_38, %c0_39, %c0_40] : memref<2x8x14xf32, #tpu.memory_space<vmem>>, vector<2x8x14xf32>
      tpu.vector_store %arg5[%c0_38, %c0_39, %c0_40], %57 {strides = array<i32>} : memref<2x8x14xf32, #tpu.memory_space<vmem>>, vector<2x8x14xf32>,
    } else {
    }
    return
  }
  func.func @transform_0(%arg0: i32) -> (i32, i32, i32) {
    %c0_i32 = arith.constant 0 : i32
    %c0_i32_0 = arith.constant 0 : i32
    %c0_i32_1 = arith.constant 0 : i32
    return %arg0, %c0_i32, %c0_i32_0 : i32, i32, i32
  }
  func.func @transform_1(%arg0: i32) -> (i32, i32) {
    %c0_i32 = arith.constant 0 : i32
    %c0_i32_0 = arith.constant 0 : i32
    %c0_i32_1 = arith.constant 0 : i32
    return %c0_i32, %c0_i32_0 : i32, i32
  }
  func.func @transform_2(%arg0: i32) -> (i32, i32) {
    %c0_i32 = arith.constant 0 : i32
    %c0_i32_0 = arith.constant 0 : i32
    %c0_i32_1 = arith.constant 0 : i32
    return %c0_i32, %c0_i32_0 : i32, i32
  }
  func.func @transform_3(%arg0: i32) -> (i32, i32) {
    %c0_i32 = arith.constant 0 : i32
    %c0_i32_0 = arith.constant 0 : i32
    %c0_i32_1 = arith.constant 0 : i32
    return %c0_i32, %c0_i32_0 : i32, i32
  }
  func.func @transform_4(%arg0: i32) -> (i32, i32, i32) {
    %c0_i32 = arith.constant 0 : i32
    %c0_i32_0 = arith.constant 0 : i32
    %c0_i32_1 = arith.constant 0 : i32
    %c0_i32_2 = arith.constant 0 : i32
    return %c0_i32, %c0_i32_0, %c0_i32_1 : i32, i32, i32
  }
}

</mosaic_0001>

<bundles_post_ra>
// kernel: tpu_custom_call.1
= control target key start
LH: loop header
LB: loop body
LE: loop exit
PB: predicated region body
PF: predicated region fallthrough
CT: control target
= control target key end

     0   :  { %9 = vsyncpa [#allocation5], 0  ;;  %s514_s15 = smov 0   ;;  %s572_s0 = inlined_call_operand.vmem [shape: f32[2,4,16], index: 0, kind: input, shape index: {}]   ;;  %s573_s1 = inlined_call_operand.vmem [shape: f32[8,12], index: 1, kind: input, shape index: {}]   ;;  %s574_s2 = inlined_call_operand.vmem [shape: f32[8,1], index: 2, kind: input, shape index: {}]   ;;  %s575_s3 = inlined_call_operand.vmem [shape: f32[8,1], index: 3, kind: input, shape index: {}]   ;;  %s576_s4 = inlined_call_operand.hbm [shape: f32[2,8,14], index: 4, kind: output, shape index: {}]  }
   0x1 LB: > { %s520_s16 = sadd.s32 4294967295, %s476_s15   ;;  %p387_p0 = scmp.ge.s32.totalorder %s476_s15, 1  ;;  %s476_s15 = sphi %s514_s15, %s15_s15  }
   0x2   : > { %p157_p1 = scmp.lt.s32.totalorder %s476_s15, 3 }
   0x4   : > { %p158_p2 = pnand %p387_p0, %p157_p1 }
   0x5   : > { %p177_p3 = scmp.lt.s32.totalorder (!%p158_p2), %s520_s16, 1  ;;  %p389_p4 = scmp.ne.s32.totalorder (!%p158_p2), %s520_s16, 0 }
   0x6   : > { %161 = sbr.rel (%p158_p2) target bundleno = 700 (0x2bc), region = 36 }
   0xd   : > { %s178_s17 = scalar_select %p177_p3, %s520_s16, 1 }
   0xe   : > { %184 = sbr.rel (%p389_p4) target bundleno = 21 (0x15), region = 40  ;;  %vm185_vm0 = vcmask (!%p389_p4), 7168   ;;  %v478_v0 = vmov (!%p389_p4), 0.0  }
   0xf   : > { %s388_s18 = sshll.u32 %s178_s17, 2  ;;  %186 = vst.msk [vmem:[#allocation2] sm:$0xff] (!%p389_p4), %vm185_vm0, %v478_v0  ;;  %187 = vst.msk [vmem:[#allocation3] sm:$0xff] (!%p389_p4), %vm185_vm0, %v478_v0 }
  0x10   : > { %s180_s21 = scalar_lea.vmem %s572_s0, %s388_s18 }
  0x15 PF: > { %v188_v1 = vld [vmem:[%s180_s21] sm:$0xf]  ;;  %v479_v3 = vmov 0.0|0.0   ;;  %vm480_vm1 = vmmov 0   ;;  %v481_v4 = vmov 0.0   ;;  %s482_s22 = smov 127  }
  0x16   : > { %v190_v2 = vrot.slane %v188_v1, 4  ;;  %408 = vmatprep.subr.bf16.mxu0 %v479_v3  ;;  %405 = vmatprep.mubr.msk.f32.mxu0 %vm480_vm1, %v481_v4  ;;  %s483_s23 = smov 126   ;;  %vm196_vm2 = vcmask 1043456   ;;  %vm484_vm3 = vmmov 1   ;;  %v198_v9 = vld [vmem:[%s573_s1] sm:$0xff]  ;;  %vm199_vm5 = vcmask 97280  }
  0x17   : > { %vm410_vm4 = vmpackc.low %vm196_vm2, %vm484_vm3  ;;  %s392_s26 = sshll.u32 %s520_s16, 3  ;;  %vm277_vm6 = vcmask 113664   ;;  %v279_v15 = vld [vmem:[#allocation2] sm:$0xff]  ;;  %vm284_vm7 = vcmask 7168   ;;  %v286_v18 = vld [vmem:[#allocation3] sm:$0xff]  ;;  %p393_p5 = scmp.ne.s32.totalorder %s520_s16, 1 }
  0x18   : > { %191 = vrot.lane.b32.xlu0 %v190_v2, %s482_s22  ;;  %s276_s27 = scalar_lea.vmem [#allocation4], %s392_s26  ;;  %v485_v23 = vmov (!%p393_p5), 0   ;;  %v303_v29 = vld [vmem:[%s574_s2] sm:$0xff] (!%p393_p5) }
  0x19   : > { %437 = vset.pattern.permute.xlu0 (!%p393_p5), %v485_v23  ;;  %v307_v32 = vld [vmem:[%s575_s3] sm:$0xff] (!%p393_p5) }
  0x1c   : > { %194 = vrot.lane.b32.xlu0 %v188_v1, %s483_s23 }
  0x8a   : > { %v192_v5 = vpop.permute.xlu0 %191 }
  0x8b   : > { %v197_v6 = vsel %vm196_vm2, %v188_v1, %v192_v5 }
  0x8e   : > { %v195_v7 = vpop.permute.xlu0 %194 }
  0x8f   : > { %v409_v8 = vpack.c.bf16 %v195_v7, %v197_v6 }
  0x91   : > { %411 = vmatpush3.bf16.msk.msra.mxu0 %vm410_vm4, %v409_v8 }
  0x94   : > { %406 = vmatmul.mubr.msk.f32.vlgmr.msra.gmra.mrb[0].mxu0 %vm199_vm5, %v198_v9 }
 0x167   : > { %v271_v10 = vpop.f32.mrb[0].mxu0 }
 0x168   : > { %v407_v11 = vpop.f32.mrb[1].mxu0  ;;  %v280_v12 = vsel %vm277_vm6, %v271_v10, 0.0  ;;  %278 = vst.msk [vmem:[%s276_s27] sm:$0xff] %vm277_vm6, %v271_v10  ;;  %v287_v13 = vmul.f32 %v271_v10, %v271_v10 }
 0x169   : > { %281 = vadd.xlane.f32.xlu1 %v280_v12 }
 0x16a   : > { %v288_v14 = vsel %vm277_vm6, %v287_v13, 0.0 }
 0x16d   : > { %289 = vadd.xlane.f32.xlu1 %v288_v14 }
 0x16f   : > { %v310_v35 = vld [vmem:[#allocation4] sm:$0xff] (!%p393_p5)  ;;  %v311_v36 = vld [vmem:[#allocation4 + $0x8] sm:$0xff] (!%p393_p5) }
 0x1f6   : > { %v282_v16 = vpop.xlane.xlu1 %281 }
 0x1f7   : > { %v283_v17 = vadd.f32 %v282_v16, %v279_v15  ;;  %296 = sbr.rel (%p393_p5) target bundleno = 674 (0x2a2), region = 44 }
 0x1f9   : > { %285 = vst.msk [vmem:[#allocation2] sm:$0xff] %vm284_vm7, %v283_v17 }
 0x1fa   : > { %v290_v19 = vpop.xlane.xlu1 %289 }
 0x1fb   : > { %v291_v20 = vadd.f32 %v290_v19, %v286_v18 }
 0x1fd   : > { %292 = vst.msk [vmem:[#allocation3] sm:$0xff] %vm284_vm7, %v291_v20 }
 0x200   : > { %v297_v21 = vld [vmem:[#allocation2] sm:$0xff] }
 0x201   : > { %v298_v24 = vmul.f32 0.035714287, %v297_v21 }
 0x203   : > { %v301_v26 = vmul.f32 %v298_v24, %v298_v24 }
 0x204   : > { %v299_v22 = vld [vmem:[#allocation3] sm:$0xff] }
 0x205   : > { %v300_v25 = vmul.f32 0.035714287, %v299_v22 }
 0x207   : > { %v302_v27 = vsub.f32 %v300_v25, %v301_v26 }
 0x209   : > { %v304_v28 = vadd.f32 1e-05, %v302_v27 }
 0x20b   : > { %438 = vrsqrt.f32 %v304_v28 }
 0x215   : > { %v439_v30 = vpop.eup %438 }
 0x216   : > { %v306_v31 = vmul.f32 %v439_v30, %v303_v29 }
 0x218   : > { %314 = vperm.xlu0 %437, %v306_v31   ;;  %v308_v33 = vmul.f32 %v306_v31, %v298_v24 }
 0x21a   : > { %v309_v34 = vsub.f32 %v307_v32, %v308_v33 }
 0x21c   : > { %321 = vperm.xlu0 %437, %v309_v34  }
 0x297   : > { %v315_v37 = vpop.permute.xlu0 %314 }
 0x298   : > { %v317_v38 = vmul.f32 %v315_v37, %v310_v35  ;;  %v318_v39 = vmul.f32 %v315_v37, %v311_v36 }
 0x29b   : > { %v322_v40 = vpop.permute.xlu0 %321 }
 0x29c   : > { %v324_v41 = vadd.f32 %v322_v40, %v317_v38  ;;  %v325_v42 = vadd.f32 %v322_v40, %v318_v39 }
 0x29e   : > { %vm326_vm8 = vcmp.gt.f32.partialorder %v324_v41, 0.0  ;;  %vm327_vm9 = vcmp.gt.f32.partialorder %v325_v42, 0.0  ;;  %v328_v43 = vmul.f32 0.01, %v324_v41  ;;  %v329_v44 = vmul.f32 0.01, %v325_v42 }
 0x2a0   : > { %v330_v45 = vsel %vm326_vm8, %v324_v41, %v328_v43  ;;  %v331_v46 = vsel %vm327_vm9, %v325_v42, %v329_v44 }
 0x2a1   : > { %332 = vst.msk [vmem:[#allocation4] sm:$0xff] %vm277_vm6, %v330_v45  ;;  %333 = vst.msk [vmem:[#allocation4 + $0x8] sm:$0xff] %vm277_vm6, %v331_v46 }
 0x2a2 PF: > { %p416_p6 = scmp.eq.s32.totalorder %s520_s16, 1  ;;  %s486_s6 = smov [#allocation4]  }
 0x2a3   : > { %s340_s7 = sshll.u32 %s486_s6, 4  ;;  %s341_s7 = int_to_ptr.vmem [resolvable:$true] %s340_s7 }
 0x2a4   : > { %s440_s8 = scalar_lea.vmem %s341_s7, 256  ;;  %p447_p10 = scmp.lt.s32.totalorder %s341_s7, %s341_s7 }
 0x2a5   : > { %p441_p7 = scmp.ne.s32.totalorder %s341_s7, %s440_s8  ;;  %p448_p11 = scmp.lt.s32.totalorder %s440_s8, %s440_s8 }
 0x2a7   : > { %p442_p8 = pnand %p441_p7, %p416_p6  ;;  %p449_p12 = por %p448_p11, %p447_p10 }
 0x2a9   : > { %p443_p9 = pneg %p442_p8 }
 0x2ab   : > { %p450_p13 = pnand %p449_p12, %p443_p9 }
 0x2ad   : > { %453 = shalt.err (!%p450_p13)
}
 0x2ae   : > { %s454_s11 = scalar_lea.hbm %s576_s4, 256 }
 0x2af   : > { %p455_p0 = scmp.ne.s32.totalorder %s576_s4, %s454_s11  ;;  %p460_p3 = scmp.lt.u32.totalorder %s454_s11, %s576_s4 }
 0x2b1   : > { %p456_p1 = pnand %p455_p0, %p416_p6 }
 0x2b3   : > { %p457_p2 = pneg %p456_p1 }
 0x2b5   : > { %p462_p4 = pnand %p460_p3, %p457_p2 }
 0x2b7   : > { %465 = shalt.err (!%p462_p4)
}
 0x2b8   : > { %s487_s18 = smov 128   ;;  %s488_s19 = smov 8  }
 0x2b9   : > { %413 = dma.vmem_to_hbm [thread:$0]  (%p416_p6), %s341_s7, 256, %s576_s4, [#allocation5], %s487_s18, %s487_s18, %s488_s19  }
 0x2ba   : > { %471 = dma.done.wait (%p416_p6), [#allocation5], 256  }
 0x2bb   : > { %473 = vsyncadd (%p416_p6), [#allocation5], 4294967040 }
 0x2bc PF: > { %s15_s15 = sadd.s32 1, %s476_s15  }
 0x2bd   : > { %p12_p5 = scmp.ge.s32.totalorder %s15_s15, 4  }
 0x2bf   :  { %14 = sbr.rel (!%p12_p5) target bundleno = 1 (0x1), region = 72 }
 0x2c6   :  { %356 = vsyncpa [#allocation5], 1 }
 0x2c7   :  { %358 = vsyncpa [#allocation5 + $0x1], 1 }

</bundles_post_ra>
